<compile_context>
chip_gen: v7x
topology: tpu7x:2x2x1
jax: 0.10.0
libtpu: 0.0.40
codegen_flags: <defaults>
</compile_context>

<pallas_src>
import jax
import jax.numpy as jnp
from jax import lax
from jax.experimental import pallas as pl
from jax.experimental.pallas import tpu as pltpu


_MAX_TILE_ROWS = 2048  # rows/tile (mult. of 8); 2048*128*4B = 1 MiB f32 per input tile


def _make_kernel(T, D, W, tile_rows):
    rows_times_w = tile_rows * W

    def kernel(len_ref, x_ref, t_ref, out_ref, acc_ref):
        b = pl.program_id(0)
        j = pl.program_id(1)

        @pl.when(j == 0)
        def _():
            acc_ref[...] = jnp.zeros_like(acc_ref)

        # Native-dtype tiles, upcast to f32 in-register (single cast point).
        x = x_ref[0].astype(jnp.float32)
        t = t_ref[0].astype(jnp.float32)
        diff = x - t
        sq = diff * diff

        # Valid-element limit for this tile as a flat offset inside this batch's
        # (T*D)-element slab, clamped to T*D so out-of-bounds / ragged-tile
        # garbage contributes zero (denominator uses unclamped lengths -> same
        # semantics as the PyTorch reference).
        limit = jnp.minimum(len_ref[b], T) * D - j * rows_times_w
        flat = (lax.broadcasted_iota(jnp.int32, (tile_rows, W), 0) * W
                + lax.broadcasted_iota(jnp.int32, (tile_rows, W), 1))
        acc_ref[...] += jnp.where(flat < limit, sq, 0.0)

        # Finalize once per batch: sublane reduce only; horizontal (lane) reduce
        # deferred to the tiny wrapper-side sum.
        @pl.when(j == pl.num_programs(1) - 1)
        def _():
            out_ref[...] = jnp.sum(acc_ref[...], axis=0,
                                   keepdims=True).reshape(1, 1, W)

    return kernel


def mse_loss_masked(inp, target, length):
    """Pallas equivalent of MSELossMasked.forward(input, target, length)."""
    B, T, D = inp.shape
    length_i32 = length.astype(jnp.int32).reshape(B)

    # Lane-dense view of each batch's (T, D) slab when possible.
    if (T * D) % 128 == 0:
        W = 128
        NR = (T * D) // 128
    else:
        W = D
        NR = T
    x2 = inp.reshape(B, NR, W)          # free (contiguous) reshape, no cast
    t2 = target.reshape(B, NR, W)

    tile_rows = NR if NR <= _MAX_TILE_ROWS else _MAX_TILE_ROWS
    num_tiles = pl.cdiv(NR, tile_rows)

    kernel = _make_kernel(T, D, W, tile_rows)

    grid_spec = pltpu.PrefetchScalarGridSpec(
        num_scalar_prefetch=1,          # `length` lands in SMEM
        grid=(B, num_tiles),
        in_specs=[
            pl.BlockSpec((1, tile_rows, W), lambda b, j, lens: (b, j, 0)),
            pl.BlockSpec((1, tile_rows, W), lambda b, j, lens: (b, j, 0)),
        ],
        out_specs=pl.BlockSpec((1, 1, W), lambda b, j, lens: (b, 0, 0)),
        scratch_shapes=[pltpu.VMEM((tile_rows, W), jnp.float32)],
    )

    partial = pl.pallas_call(
        kernel,
        out_shape=jax.ShapeDtypeStruct((B, 1, W), jnp.float32),
        grid_spec=grid_spec,
        compiler_params=pltpu.CompilerParams(
            dimension_semantics=("parallel", "arbitrary")),
    )(length_i32, x2, t2)

    # Tiny glue: cross-lane / cross-batch sum over B*W values and normalization.
    denom = jnp.sum(length_i32).astype(jnp.float32) * jnp.float32(D)
    return jnp.sum(partial) / denom


def _reference(inp, target, length):
    # Pure-JAX reference mirroring the PyTorch module.
    B, T, D = inp.shape
    sq = (inp.astype(jnp.float32) - target.astype(jnp.float32)) ** 2
    mask = (jnp.arange(T)[None, :] < length[:, None]).astype(jnp.float32)[:, :, None]
    return jnp.sum(sq * mask) / (jnp.sum(length).astype(jnp.float32) * float(D))


if __name__ == "__main__":
    key = jax.random.PRNGKey(0)
    k1, k2, k3, k4 = jax.random.split(key, 4)

    # Test 1: lane-dense path (T*D % 128 == 0).
    batch, max_len, dim = 2, 8, 32
    inp = jax.random.normal(k1, (batch, max_len, dim), dtype=jnp.float32)
    target = jax.random.normal(k2, (batch, max_len, dim), dtype=jnp.float32)
    length = jnp.array([5, 8], dtype=jnp.int32)

    loss = jax.block_until_ready(mse_loss_masked(inp, target, length))
    ref = _reference(inp, target, length)
    assert jnp.allclose(loss, ref, rtol=1e-5, atol=1e-6), (loss, ref)

    # Test 2: fallback path (T*D not a multiple of 128).
    batch2, max_len2, dim2 = 3, 7, 20
    inp2 = jax.random.normal(k3, (batch2, max_len2, dim2), dtype=jnp.float32)
    target2 = jax.random.normal(k4, (batch2, max_len2, dim2), dtype=jnp.float32)
    length2 = jnp.array([3, 7, 5], dtype=jnp.int32)

    loss2 = jax.block_until_ready(mse_loss_masked(inp2, target2, length2))
    ref2 = _reference(inp2, target2, length2)
    assert jnp.allclose(loss2, ref2, rtol=1e-5, atol=1e-6), (loss2, ref2)

    print("KERNEL_OK")
</pallas_src>

<mosaic_0001>
module attributes {stable_mosaic.version = 11 : i64} {
  func.func @kernel(%arg0: i32, %arg1: i32, %arg2: memref<2xi32, #tpu.memory_space<smem>>, %arg3: memref<1x2x128xf32, #tpu.memory_space<vmem>>, %arg4: memref<1x2x128xf32, #tpu.memory_space<vmem>>, %arg5: memref<1x1x128xf32, #tpu.memory_space<vmem>>, %arg6: memref<2x128xf32, #tpu.memory_space<vmem>>) attributes {dimension_semantics = [#tpu.dimension_semantics<parallel>, #tpu.dimension_semantics<arbitrary>], iteration_bounds = array<i64: 2, 1>, scalar_prefetch = 1 : i64, scratch_operands = 1 : i64, tpu.core_type = #tpu.core_type<tc>, window_params = [{transform_indices = @transform_0, window_bounds = array<i64: 1, 2, 128>}, {transform_indices = @transform_1, window_bounds = array<i64: 1, 2, 128>}, {transform_indices = @transform_2, window_bounds = array<i64: 1, 1, 128>}]} {
    %c0_i32 = arith.constant 0 : i32
    %0 = arith.cmpi eq, %arg1, %c0_i32 : i32
    %1 = arith.extui %0 : i1 to i32
    %c0_i32_0 = arith.constant 0 : i32
    %2 = arith.cmpi ne, %1, %c0_i32_0 : i32
    scf.if %2 {
      %cst_12 = arith.constant 0.000000e+00 : f32
      %30 = vector.broadcast %cst_12 : f32 to vector<2x128xf32>
      %c0_13 = arith.constant 0 : index
      %c0_14 = arith.constant 0 : index
      %31 = vector.load %arg6[%c0_13, %c0_14] : memref<2x128xf32, #tpu.memory_space<vmem>>, vector<2x128xf32>
      tpu.vector_store %arg6[%c0_13, %c0_14], %30 {strides = array<i32>} : memref<2x128xf32, #tpu.memory_space<vmem>>, vector<2x128xf32>,
    } else {
    }
    %c0 = arith.constant 0 : index
    %c0_1 = arith.constant 0 : index
    %c0_2 = arith.constant 0 : index
    %3 = vector.load %arg3[%c0, %c0_1, %c0_2] : memref<1x2x128xf32, #tpu.memory_space<vmem>>, vector<1x2x128xf32>
    %4 = vector.shape_cast %3 : vector<1x2x128xf32> to vector<2x128xf32>
    %c0_3 = arith.constant 0 : index
    %c0_4 = arith.constant 0 : index
    %c0_5 = arith.constant 0 : index
    %5 = vector.load %arg4[%c0_3, %c0_4, %c0_5] : memref<1x2x128xf32, #tpu.memory_space<vmem>>, vector<1x2x128xf32>
    %6 = vector.shape_cast %5 : vector<1x2x128xf32> to vector<2x128xf32>
    %7 = arith.subf %4, %6 : vector<2x128xf32>
    %8 = arith.mulf %7, %7 : vector<2x128xf32>
    %9 = arith.index_cast %arg0 : i32 to index
    %10 = memref.load %arg2[%9] : memref<2xi32, #tpu.memory_space<smem>>
    %c8_i32 = arith.constant 8 : i32
    %11 = arith.minsi %10, %c8_i32 : i32
    %c32_i32 = arith.constant 32 : i32
    %12 = arith.muli %11, %c32_i32 : i32
    %c256_i32 = arith.constant 256 : i32
    %13 = arith.muli %arg1, %c256_i32 : i32
    %14 = arith.subi %12, %13 : i32
    %15 = tpu.iota {dimensions = array<i32: 0>} : vector<2x128xi32>
    %c128_i32 = arith.constant 128 : i32
    %16 = vector.broadcast %c128_i32 : i32 to vector<2x128xi32>
    %17 = arith.muli %15, %16 : vector<2x128xi32>
    %18 = tpu.iota {dimensions = array<i32: 1>} : vector<2x128xi32>
    %19 = arith.addi %17, %18 : vector<2x128xi32>
    %c0_6 = arith.constant 0 : index
    %c0_7 = arith.constant 0 : index
    %20 = vector.load %arg6[%c0_6, %c0_7] : memref<2x128xf32, #tpu.memory_space<vmem>>, vector<2x128xf32>
    %21 = vector.broadcast %14 : i32 to vector<2x128xi32>
    %22 = arith.cmpi slt, %19, %21 : vector<2x128xi32>
    %cst = arith.constant 0.000000e+00 : f32
    %23 = vector.broadcast %cst : f32 to vector<2x128xf32>
    %24 = arith.select %22, %8, %23 : vector<2x128xi1>, vector<2x128xf32>
    %25 = arith.addf %20, %24 : vector<2x128xf32>
    %c0_8 = arith.constant 0 : index
    %c0_9 = arith.constant 0 : index
    %26 = vector.load %arg6[%c0_8, %c0_9] : memref<2x128xf32, #tpu.memory_space<vmem>>, vector<2x128xf32>
    tpu.vector_store %arg6[%c0_8, %c0_9], %25 {strides = array<i32>} : memref<2x128xf32, #tpu.memory_space<vmem>>, vector<2x128xf32>,
    %c0_i32_10 = arith.constant 0 : i32
    %27 = arith.cmpi eq, %arg1, %c0_i32_10 : i32
    %28 = arith.extui %27 : i1 to i32
    %c0_i32_11 = arith.constant 0 : i32
    %29 = arith.cmpi ne, %28, %c0_i32_11 : i32
    scf.if %29 {
      %c0_12 = arith.constant 0 : index
      %c0_13 = arith.constant 0 : index
      %30 = vector.load %arg6[%c0_12, %c0_13] : memref<2x128xf32, #tpu.memory_space<vmem>>, vector<2x128xf32>
      %cst_14 = arith.constant dense<0.000000e+00> : vector<128xf32>
      %31 = vector.multi_reduction <add>, %30, %cst_14 [0] : vector<2x128xf32> to vector<128xf32>
      %32 = vector.shape_cast %31 : vector<128xf32> to vector<1x128xf32>
      %33 = vector.shape_cast %32 : vector<1x128xf32> to vector<1x1x128xf32>
      %c0_15 = arith.constant 0 : index
      %c0_16 = arith.constant 0 : index
      %c0_17 = arith.constant 0 : index
      %34 = vector.load %arg5[%c0_15, %c0_16, %c0_17] : memref<1x1x128xf32, #tpu.memory_space<vmem>>, vector<1x1x128xf32>
      tpu.vector_store %arg5[%c0_15, %c0_16, %c0_17], %33 {strides = array<i32>} : memref<1x1x128xf32, #tpu.memory_space<vmem>>, vector<1x1x128xf32>,
    } else {
    }
    return
  }
  func.func @transform_0(%arg0: i32, %arg1: i32, %arg2: memref<2xi32, #tpu.memory_space<smem>>) -> (i32, i32, i32) {
    %c0_i32 = arith.constant 0 : i32
    %c0_i32_0 = arith.constant 0 : i32
    return %arg0, %arg1, %c0_i32 : i32, i32, i32
  }
  func.func @transform_1(%arg0: i32, %arg1: i32, %arg2: memref<2xi32, #tpu.memory_space<smem>>) -> (i32, i32, i32) {
    %c0_i32 = arith.constant 0 : i32
    %c0_i32_0 = arith.constant 0 : i32
    return %arg0, %arg1, %c0_i32 : i32, i32, i32
  }
  func.func @transform_2(%arg0: i32, %arg1: i32, %arg2: memref<2xi32, #tpu.memory_space<smem>>) -> (i32, i32, i32) {
    %c0_i32 = arith.constant 0 : i32
    %c0_i32_0 = arith.constant 0 : i32
    %c0_i32_1 = arith.constant 0 : i32
    return %arg0, %c0_i32, %c0_i32_0 : i32, i32, i32
  }
}

</mosaic_0001>

<bundles_post_ra>
// kernel: tpu_custom_call.1
= control target key start
LH: loop header
LB: loop body
LE: loop exit
PB: predicated region body
PF: predicated region fallthrough
CT: control target
= control target key end

     0   :  { %s767_s0 = inlined_call_operand.hbm [shape: s32[2], index: 0, kind: input, shape index: {}]   ;;  %s768_s1 = inlined_call_operand.hbm [shape: f32[2,2,128], index: 1, kind: input, shape index: {}]   ;;  %s769_s2 = inlined_call_operand.vmem [shape: f32[2,2,128], index: 2, kind: input, shape index: {}]   ;;  %s770_s3 = inlined_call_operand.hbm [shape: f32[2,1,128], index: 3, kind: output, shape index: {}]  }
   0x1   :  { %s426_s14 = scalar_lea.hbm %s767_s0, 16 }
   0x2   :  { %p427_p0 = scmp.ne.s32.totalorder %s767_s0, %s426_s14  ;;  %p430_p1 = scmp.lt.u32.totalorder %s426_s14, %s767_s0 }
   0x4   :  { %p432_p2 = pnand %p430_p1, %p427_p0 }
   0x6   :  { %435 = shalt.err (!%p432_p2)  }
   0x7   :  { %s552_s19 = smov [#allocation4]  }
   0x8   :  { %9 = dma.hbm_to_smem %s767_s0, 16, %s552_s19, [#allocation3] }
   0x9   :  { %518 = dma.done.wait [#allocation3], 16 }
   0xa   :  { %519 = vsyncadd [#allocation3], 4294967280 }
   0xb   :  { %11 = sfence }
   0xc   :  { %12 = vsyncpa [#allocation6], 0 }
   0xd   :  { %14 = vsyncpa [#allocation6 + $0x1], 0 }
   0xe   :  { %15 = vsyncpa [#allocation7], 0 }
   0xf   :  { %17 = vsyncpa [#allocation7 + $0x1], 0  ;;  %s588_s22 = smov 0   ;;  %s590_s23 = smov 0  }
  0x10   :  { %s592_s24 = smov 0   ;;  %s594_s25 = smov 0  }
  0x11   :  { %s596_s26 = smov 0   ;;  %s598_s27 = smov 0  }
  0x12 LB: > { %s349_s0 = sadd.s32 4294967295, %s550_s27   ;;  %s350_s28 = sadd.s32 4294967294, %s550_s27   ;;  %s550_s27 = sphi %s598_s27, %s23_s27   ;;  %s546_s26 = sphi %s596_s26, %s786_s26   ;;  %s542_s25 = sphi %s594_s25, %s785_s25   ;;  %s538_s24 = sphi %s592_s24, %s784_s24   ;;  %s534_s23 = sphi %s590_s23, %s783_s23   ;;  %s530_s22 = sphi %s588_s22, %s782_s22  }
  0x13   : > { %s35_s29 = sadd.s32 1, %s546_s26  ;;  %s44_s30 = sadd.s32 1, %s538_s24 }
  0x14   : > { %p37_p3 = scmp.ge.s32.totalorder %s35_s29, 2  ;;  %p51_p4 = scmp.ne.s32.totalorder %s538_s24, %s534_s23 }
  0x15   : > { %p52_p5 = scmp.eq.s32.totalorder %s550_s27, 0  ;;  %p57_p6 = scmp.ne.s32.totalorder %s534_s23, %s530_s22 }
  0x16   : > { %s788_s29 = smov (%p37_p3, %s35_s29), 0  ;;  %p58_p8 = scmp.eq.s32.totalorder %s349_s0, 0 }
  0x17   : > { %p629_p7 = por %p52_p5, %p51_p4  ;;  %s39_s5 = ssub.s32 %s546_s26, %s788_s29 }
  0x18   : > { %p109_p9 = scmp.eq.s32.totalorder %s349_s0, 1  ;;  %p42_p10 = scmp.eq.s32.totalorder %s39_s5, 0 }
  0x19   : > { %p635_p11 = por %p58_p8, %p57_p6  ;;  %p115_p13 = scmp.eq.s32.totalorder %s350_s28, 1 }
  0x1a   : > { %p639_p12 = por %p109_p9, %p51_p4  ;;  %p374_p2 = scmp.lt.s32.totalorder %s550_s27, 2 }
  0x1b   : > { %s644_s8 = scalar_select %p42_p10, %s538_s24, %s44_s30  }
  0x1c   : > { %s774_s7 = scalar_select %p639_p12, 1, 0 }
  0x1d   : > { %p646_p0 = por %p115_p13, %p57_p6  ;;  %s135_s10 = sand.u32 1, %s538_s24  }
  0x1e   : > { %s353_s11 = sshll.u32 %s135_s10, 1  ;;  %s354_s12 = sshll.u32 %s546_s26, 5 }
  0x1f   : > { %s775_s9 = scalar_select %p646_p0, 1, 0 }
  0x20   : > { %s657_s15 = scalar_lea.hbm %s768_s1, %s354_s12  ;;  %s139_s16 = scalar_lea.vmem [#allocation5], %s353_s11 }
  0x21   : > { %s147_s17 = sshll.u32 %s139_s16, 4  ;;  %p663_p3 = pnand %p374_p2, %p629_p7  ;;  %s659_s17 = int_to_ptr.vmem [resolvable:$true] %s147_s17 }
  0x22   : > { %s136_s19 = scalar_lea.sflag [#allocation6], %s135_s10  ;;  %s436_s20 = scalar_lea.hbm %s657_s15, 32 }
  0x23   : > { %p437_p6 = scmp.ne.s32.totalorder %s657_s15, %s436_s20  ;;  %p438_p8 = pneg %p663_p3 }
  0x24   : > { %s441_s28 = scalar_lea.hbm %s768_s1, 64  ;;  %p442_p7 = scmp.lt.u32.totalorder %s657_s15, %s768_s1 }
  0x25   : > { %p439_p9 = pnand %p438_p8, %p437_p6  ;;  %p443_p13 = scmp.lt.u32.totalorder %s441_s28, %s436_s20 }
  0x26   : > { %p445_p1 = scmp.lt.u32.totalorder %s436_s20, %s657_s15 }
  0x27   : > { %p440_p10 = pneg %p439_p9  ;;  %p444_p2 = por %p443_p13, %p442_p7 }
  0x29   : > { %p446_p4 = por %p445_p1, %p444_p2 }
  0x2b   : > { %p447_p5 = pnand %p446_p4, %p440_p10 }
  0x2d   : > { %450 = shalt.err (!%p447_p5)
}
  0x2e   : > { %s451_s5 = scalar_lea.vmem %s659_s17, 32  ;;  %s553_s10 = smov [#allocation5]  }
  0x2f   : > { %p452_p6 = scmp.ne.s32.totalorder %s659_s17, %s451_s5  ;;  %s456_s11 = sshll.u32 %s553_s10, 4  ;;  %s457_s11 = int_to_ptr.vmem [resolvable:$false] %s456_s11 }
  0x30   : > { %s458_s12 = scalar_lea.vmem %s457_s11, 64  ;;  %p459_p12 = scmp.lt.s32.totalorder %s659_s17, %s457_s11 }
  0x31   : > { %p454_p9 = pnand %p452_p6, %p438_p8  ;;  %p460_p7 = scmp.lt.s32.totalorder %s458_s12, %s451_s5 }
  0x33   : > { %p455_p0 = pneg %p454_p9  ;;  %p461_p13 = por %p460_p7, %p459_p12 }
  0x35   : > { %p462_p1 = pnand %p461_p13, %p455_p0 }
  0x37   : > { %465 = shalt.err (!%p462_p1)
}
  0x38   : > { %369 = dma.hbm_to_vmem [thread:$0]  (!%p663_p3), %s657_s15, 32, %s659_s17, %s136_s19  }
  0x39   : > { %p777_p4 = scmp.lt.s32.totalorder %s550_s27, 3  ;;  %p778_p5 = scmp.ge.s32.totalorder %s550_s27, 1 }
  0x3b   : > { %p163_p8 = pnand %p778_p5, %p777_p4 }
  0x3c   : > { %s699_s13 = sand.u32 (!%p163_p8), 1, %s534_s23  }
  0x3d   : > { %166 = sbr.rel (%p163_p8) target bundleno = 119 (0x77), region = 28  ;;  %s356_s14 = sshll.u32 (!%p163_p8), %s699_s13, 1 }
  0x3e   : > { %s169_s16 = scalar_lea.sflag (!%p163_p8), [#allocation6], %s699_s13  ;;  %s172_s20 = scalar_lea.vmem (!%p163_p8), [#allocation5], %s356_s14 }
  0x44   : > { %521 = dma.done.wait (%p635_p11), %s169_s16, 32  }
  0x45   : > { %523 = vsyncadd (%p635_p11), %s169_s16, 4294967264  ;;  %p199_p12 = scmp.lt.s32.totalorder %s542_s25, 1  ;;  %v221_v0 = vlaneseq  ;;  %v554_v1 = vmov 0.0   ;;  %s215_s15 = sld [smem:[#allocation4 + %s542_s25]]  ;;  %v211_v5 = vld [vmem:[%s172_s20] sm:$0x3] }
  0x46   : > { %210 = vst [vmem:[#allocation2] sm:$0x3] %v554_v1  ;;  %vm237_vm1 = vcmask 1041408   ;;  %s198_s28 = scalar_lea.vmem [#allocation8], %s699_s13  ;;  %s359_s4 = sshll.u32 %s542_s25, 4 }
  0x47   : > { %s200_s17 = scalar_select %p199_p12, %s542_s25, 1  ;;  %v222_v2 = vshrl.u32 %v221_v0, 7  ;;  %v225_v4 = vand.u32 127, %v221_v0 }
  0x48   : > { %s259_s30 = sshll.u32 %s198_s28, 4  ;;  %s720_s11 = scalar_lea.hbm %s770_s3, %s359_s4  ;;  %s715_s30 = int_to_ptr.vmem [resolvable:$true] %s259_s30 }
  0x49   : > { %s357_s18 = sshll.u32 %s200_s17, 1  ;;  %v223_v3 = vmul.u32 128, %v222_v2  ;;  %s247_s12 = scalar_lea.sflag [#allocation7], %s699_s13 }
  0x4a   : > { %s205_s0 = scalar_lea.vmem %s769_s2, %s357_s18  ;;  %s466_s14 = scalar_lea.vmem %s715_s30, 16 }
  0x4b   : > { %v212_v6 = vld [vmem:[%s205_s0] sm:$0x3]  ;;  %p216_p11 = scmp.lt.s32.totalorder %s215_s15, 8  ;;  %v226_v8 = vadd.s32 %v225_v4, %v223_v3  ;;  %p467_p0 = scmp.ne.s32.totalorder %s715_s30, %s466_s14 }
  0x4c   : > { %v213_v7 = vsub.f32 %v211_v5, %v212_v6  ;;  %p779_p3 = scmp.ne.s32.totalorder %s774_s7, 0  ;;  %s555_s25 = smov [#allocation8]  }
  0x4d   : > { %s790_s15 = smov (!%p216_p11, %s215_s15), 8  ;;  %v227_v10 = vld [vmem:[#allocation2] sm:$0x3]  ;;  %s470_s16 = sshll.u32 %s555_s25, 4  ;;  %s471_s16 = int_to_ptr.vmem [resolvable:$false] %s470_s16 }
  0x4e   : > { %v214_v9 = vmul.f32 %v213_v7, %v213_v7  ;;  %s358_s6 = sshll.u32 %s790_s15, 5  ;;  %p468_p10 = pnand %p467_p0, %p779_p3 }
  0x4f   : > { %v228_v11 = vstv %s358_s6  ;;  %s472_s20 = scalar_lea.vmem %s471_s16, 32  ;;  %p473_p6 = scmp.lt.s32.totalorder %s715_s30, %s471_s16 }
  0x50   : > { %vm229_vm0 = vcmp.lt.s32.totalorder %v226_v8, %v228_v11  ;;  %p469_p2 = pneg %p468_p10  ;;  %p474_p9 = scmp.lt.s32.totalorder %s472_s20, %s466_s14 }
  0x51   : > { %v230_v12 = vsel %vm229_vm0, %v214_v9, 0.0 }
  0x52   : > { %v231_v13 = vadd.f32 %v230_v12, %v227_v10  ;;  %p475_p7 = por %p474_p9, %p473_p6 }
  0x54   : > { %232 = vst [vmem:[#allocation2] sm:$0x3] %v231_v13  ;;  %p476_p13 = pnand %p475_p7, %p469_p2 }
  0x5b   : > { %v236_v14 = vld [vmem:[#allocation2] sm:$0x3] }
  0x5c   : > { %v238_v15 = vsel %vm237_vm1, %v236_v14, 0.0 }
  0x5d   : > { %v239_v16 = vrot.slane %v238_v15, 4 }
  0x5f   : > { %v240_v17 = vadd.f32 %v239_v16, %v238_v15 }
  0x61   : > { %v241_v18 = vrot.slane %v240_v17, 2 }
  0x63   : > { %v242_v19 = vadd.f32 %v241_v18, %v240_v17 }
  0x65   : > { %v243_v20 = vrot.slane %v242_v19, 1 }
  0x67   : > { %v244_v21 = vadd.f32 %v243_v20, %v242_v19 }
  0x69   : > { %245 = vst [vmem:[%s198_s28] sm:$0x1] %v244_v21 }
  0x6a   : > { %479 = shalt.err (!%p476_p13)
}
  0x6b   : > { %s480_s13 = scalar_lea.hbm %s720_s11, 16  ;;  %s484_s18 = scalar_lea.hbm %s770_s3, 32 }
  0x6c   : > { %p481_p1 = scmp.ne.s32.totalorder %s720_s11, %s480_s13  ;;  %p485_p8 = scmp.lt.u32.totalorder %s720_s11, %s770_s3 }
  0x6d   : > { %p486_p12 = scmp.lt.u32.totalorder %s484_s18, %s480_s13  ;;  %p488_p0 = scmp.lt.u32.totalorder %s480_s13, %s720_s11 }
  0x6e   : > { %p482_p4 = pnand %p481_p1, %p779_p3 }
  0x6f   : > { %p487_p11 = por %p486_p12, %p485_p8 }
  0x70   : > { %p483_p5 = pneg %p482_p4 }
  0x71   : > { %p489_p10 = por %p488_p0, %p487_p11 }
  0x73   : > { %p490_p2 = pnand %p489_p10, %p483_p5 }
  0x75   : > { %493 = shalt.err (!%p490_p2)
}
  0x76   : > { %364 = dma.vmem_to_hbm [thread:$0]  (%p779_p3), %s715_s30, 16, %s720_s11, %s247_s12  }
  0x77 PF: > { %s271_s0 = sand.u32 1, %s530_s22   ;;  %p780_p6 = scmp.ne.s32.totalorder %s775_s9, 0 }
  0x78   : > { %p781_p9 = scmp.ge.s32.totalorder %s550_s27, 2  ;;  %s272_s6 = scalar_lea.sflag [#allocation7], %s271_s0 }
  0x7a   : > { %p371_p7 = pnand %p781_p9, %p780_p6 }
  0x7c   : > { %525 = dma.done.wait (!%p371_p7), %s272_s6, 16  }
  0x7d   : > { %527 = vsyncadd (!%p371_p7), %s272_s6, 4294967280  ;;  %s23_s27 = sadd.s32 1, %s550_s27   ;;  %s782_s22 = smov %s534_s23 }
  0x7e   : > { %p20_p13 = scmp.ge.s32.totalorder %s23_s27, 4   ;;  %s783_s23 = smov %s538_s24 }
  0x7f   : > { %s784_s24 = smov %s644_s8  ;;  %s785_s25 = smov %s546_s26 }
  0x80   : > { %s786_s26 = smov %s788_s29  ;;  %22 = sbr.rel (!%p20_p13) target bundleno = 18 (0x12), region = 84 }
  0x87   :  { %276 = vsyncpa [#allocation6], 1 }
  0x88   :  { %278 = vsyncpa [#allocation6 + $0x1], 1 }
  0x89   :  { %279 = vsyncpa [#allocation7], 1 }
  0x8a   :  { %281 = vsyncpa [#allocation7 + $0x1], 1 }

</bundles_post_ra>
